<compile_context>
chip_gen: v5e
topology: v5e:2x2
jax: 0.10.0
libtpu: 0.0.40
codegen_flags: <defaults>
</compile_context>

<pallas_src>
import functools

import jax
import jax.numpy as jnp
from jax.experimental import pallas as pl
from jax.experimental.pallas import tpu as pltpu


def mlp_kernel(x_ref, w1_ref, b1_ref, w2_ref, b2_ref, w3_ref, b3_ref, o_ref,
               *, sub_tm, n_chunks):
    # Weights/biases are resident (constant index_maps); load once per grid step.
    w1 = w1_ref[...]            # (80, dim)  bf16
    b1 = b1_ref[...]            # (80, 1)    f32
    w2 = w2_ref[...]            # (10, 80)   bf16
    b2 = b2_ref[...]            # (10, 1)    f32
    w3 = w3_ref[...]            # (10, 1)    f32
    b3 = b3_ref[...]            # (1, 1)     f32

    # Inner chunk loop: keeps (80, sub_tm) intermediates small even when the grid tile (tm)
    # is large enough to amortize per-step overhead.  sub_tm / n_chunks are static Python
    # ints, so every slice below is static (zero-cost views, aligned lane-dense stores).
    for c in range(n_chunks):
        lo = c * sub_tm
        hi = lo + sub_tm
        xt = x_ref[lo:hi, :].astype(jnp.bfloat16)                     # (sub_tm, dim) bf16
        # layer 1: Linear(dim, 80) + ReLU; contract both last dims -> batch on lanes.
        h1 = jax.lax.dot_general(w1, xt, (((1,), (1,)), ((), ())),
                                 preferred_element_type=jnp.float32) + b1
        h1 = jnp.maximum(h1, 0.0)                                     # (80, sub_tm) f32
        # dropout (eval mode) -> identity
        # layer 2: Linear(80, 10) + ReLU
        h2 = jnp.dot(w2, h1.astype(w2.dtype),
                     preferred_element_type=jnp.float32) + b2
        h2 = jnp.maximum(h2, 0.0)                                     # (10, sub_tm) f32
        # dropout (eval mode) -> identity
        # layer 3: Linear(10, 1) on VPU (elementwise) + sublane reduce -- skip the MXU for N=1.
        out = jnp.sum(h2 * w3, axis=0, keepdims=True) + b3            # (1, sub_tm) f32
        o_ref[:, lo:hi] = out.astype(o_ref.dtype)                     # lane-dense store


def prepare_params(params):
    """PyTorch-layout params ([out,in], [out]) -> kernel layout (bf16 weights, column biases)."""
    w1, b1, w2, b2, w3, b3 = params
    return (
        w1.astype(jnp.bfloat16),                   # (80, dim)
        b1.astype(jnp.float32).reshape(-1, 1),     # (80, 1)
        w2.astype(jnp.bfloat16),                   # (10, 80)
        b2.astype(jnp.float32).reshape(-1, 1),     # (10, 1)
        w3.astype(jnp.float32).reshape(-1, 1),     # (1, 10) -> (10, 1) column for VPU layer 3
        b3.astype(jnp.float32).reshape(1, 1),      # (1, 1)
    )


def mlp_forward(x, prepared_params, *, tm=16384, sub_tm=4096):
    """x: [B, dim] float32 -> [B] float32 (matching MLP.forward's squeeze(dim=-1))."""
    w1p, b1p, w2p, b2p, w3p, b3p = prepared_params
    B, dim = x.shape
    h1 = w1p.shape[0]
    h2 = w2p.shape[0]

    # Lane-chunk / batch-tile sizes: multiples of 128 lanes; don't tile far past the batch.
    b_rounded = pl.cdiv(B, 128) * 128
    sub_tm = max(128, min((sub_tm // 128) * 128, b_rounded))
    tm = max(sub_tm, min((tm // sub_tm) * sub_tm, pl.cdiv(b_rounded, sub_tm) * sub_tm))
    n_chunks = tm // sub_tm
    n_steps = pl.cdiv(B, tm)
    b_out = n_steps * tm   # output padded so every output block is a full (1, tm) store

    # Scoped-VMEM budget: x/out double buffers + resident weights + per-chunk intermediates
    # (conservatively counts all chunks live since the inner loop is statically unrolled).
    vmem_bytes = (
        2 * tm * dim * 4 + 2 * tm * 4                                   # x, out double buffers
        + 2 * (h1 * dim * 2 + h1 * 4 + h2 * h1 * 2 + 2 * h2 * 4 + 4)    # weights / biases
        + n_chunks * sub_tm * (dim * 2 + h1 * 6 + h2 * 4 + 8)           # chunk intermediates
    )
    vmem_limit = int(min(max(2 * vmem_bytes, 32 * 1024 * 1024), 64 * 1024 * 1024))

    kernel = functools.partial(mlp_kernel, sub_tm=sub_tm, n_chunks=n_chunks)
    out = pl.pallas_call(
        kernel,
        out_shape=jax.ShapeDtypeStruct((1, b_out), jnp.float32),
        grid_spec=pltpu.PrefetchScalarGridSpec(
            num_scalar_prefetch=0,
            grid=(n_steps,),
            in_specs=[
                pl.BlockSpec((tm, dim), lambda i: (i, 0)),    # x streamed in native [B, dim]
                pl.BlockSpec((h1, dim), lambda i: (0, 0)),    # W1 (resident: constant map)
                pl.BlockSpec((h1, 1), lambda i: (0, 0)),      # b1
                pl.BlockSpec((h2, h1), lambda i: (0, 0)),     # W2 (resident)
                pl.BlockSpec((h2, 1), lambda i: (0, 0)),      # b2
                pl.BlockSpec((h2, 1), lambda i: (0, 0)),      # w3 column (VPU layer 3)
                pl.BlockSpec((1, 1), lambda i: (0, 0)),       # b3
            ],
            out_specs=pl.BlockSpec((1, tm), lambda i: (0, i)),  # lane-dense output tile
        ),
        compiler_params=pltpu.CompilerParams(
            dimension_semantics=("parallel",),   # batch tiles independent -> megacore shardable
            vmem_limit_bytes=vmem_limit,
        ),
    )(x, w1p, b1p, w2p, b2p, w3p, b3p)
    # Rows of the last (partial) x block beyond B are uninitialized; their garbage stays
    # confined to output columns >= B and is sliced off here.
    return out[0, :B]


def init_params(key, dim):
    """Deterministic synthetic params in PyTorch nn.Linear layout ([out, in], [out])."""
    k1, k2, k3, k4, k5, k6 = jax.random.split(key, 6)
    w1 = jax.random.normal(k1, (80, dim), jnp.float32) * 0.1
    b1 = jax.random.normal(k2, (80,), jnp.float32) * 0.1
    w2 = jax.random.normal(k3, (10, 80), jnp.float32) * 0.1
    b2 = jax.random.normal(k4, (10,), jnp.float32) * 0.1
    w3 = jax.random.normal(k5, (1, 10), jnp.float32) * 0.1
    b3 = jax.random.normal(k6, (1,), jnp.float32) * 0.1
    return (w1, b1, w2, b2, w3, b3)


def mlp_reference(x, params):
    w1, b1, w2, b2, w3, b3 = params
    h = jnp.maximum(x @ w1.T + b1, 0.0)
    h = jnp.maximum(h @ w2.T + b2, 0.0)
    return (h @ w3.T + b3)[:, 0]


if __name__ == "__main__":
    key = jax.random.PRNGKey(0)
    kx, kp, kx2, kx3 = jax.random.split(key, 4)

    B, dim = 8, 32
    x = jax.random.normal(kx, (B, dim), jnp.float32)
    params = init_params(kp, dim)
    prepared = prepare_params(params)

    out = jax.block_until_ready(mlp_forward(x, prepared))
    ref = mlp_reference(x, params)
    assert out.shape == (B,), out.shape
    # bf16 weight/activation path -> loosened tolerance vs. the pure-f32 reference
    assert jnp.allclose(out, ref, atol=2e-2, rtol=2e-2), (out, ref)

    # ragged batch + multi-step (pipelined / TC-shardable) grid with a partial last x block
    B2 = 300
    x2 = jax.random.normal(kx2, (B2, dim), jnp.float32)
    out2 = jax.block_until_ready(mlp_forward(x2, prepared, tm=128, sub_tm=128))
    ref2 = mlp_reference(x2, params)
    assert out2.shape == (B2,), out2.shape
    assert jnp.allclose(out2, ref2, atol=2e-2, rtol=2e-2), (out2, ref2)

    # multi-chunk inner loop (tm > sub_tm) + multi-step grid
    B3 = 1024
    x3 = jax.random.normal(kx3, (B3, dim), jnp.float32)
    out3 = jax.block_until_ready(mlp_forward(x3, prepared, tm=512, sub_tm=128))
    ref3 = mlp_reference(x3, params)
    assert out3.shape == (B3,), out3.shape
    assert jnp.allclose(out3, ref3, atol=2e-2, rtol=2e-2), (out3, ref3)

    print("KERNEL_OK")
</pallas_src>

<mosaic_0001>
module attributes {stable_mosaic.version = 11 : i64} {
  func.func @mlp_kernel(%arg0: i32, %arg1: memref<128x32xf32, #tpu.memory_space<vmem>>, %arg2: memref<80x32xbf16, #tpu.memory_space<vmem>>, %arg3: memref<80x1xf32, #tpu.memory_space<vmem>>, %arg4: memref<10x80xbf16, #tpu.memory_space<vmem>>, %arg5: memref<10x1xf32, #tpu.memory_space<vmem>>, %arg6: memref<10x1xf32, #tpu.memory_space<vmem>>, %arg7: memref<1x1xf32, #tpu.memory_space<vmem>>, %arg8: memref<1x128xf32, #tpu.memory_space<vmem>>) attributes {dimension_semantics = [#tpu.dimension_semantics<parallel>], iteration_bounds = array<i64: 1>, scalar_prefetch = 0 : i64, scratch_operands = 0 : i64, tpu.core_type = #tpu.core_type<tc>, window_params = [{transform_indices = @transform_0, window_bounds = array<i64: 128, 32>}, {pipeline_mode = #tpu.pipeline_mode<synchronous>, transform_indices = @transform_1, window_bounds = array<i64: 80, 32>}, {pipeline_mode = #tpu.pipeline_mode<synchronous>, transform_indices = @transform_2, window_bounds = array<i64: 80, 1>}, {pipeline_mode = #tpu.pipeline_mode<synchronous>, transform_indices = @transform_3, window_bounds = array<i64: 10, 80>}, {pipeline_mode = #tpu.pipeline_mode<synchronous>, transform_indices = @transform_4, window_bounds = array<i64: 10, 1>}, {pipeline_mode = #tpu.pipeline_mode<synchronous>, transform_indices = @transform_5, window_bounds = array<i64: 10, 1>}, {pipeline_mode = #tpu.pipeline_mode<synchronous>, transform_indices = @transform_6, window_bounds = array<i64: 1, 1>}, {transform_indices = @transform_7, window_bounds = array<i64: 1, 128>}]} {
    %c0 = arith.constant 0 : index
    %c0_0 = arith.constant 0 : index
    %0 = vector.load %arg2[%c0, %c0_0] : memref<80x32xbf16, #tpu.memory_space<vmem>>, vector<80x32xbf16>
    %c0_1 = arith.constant 0 : index
    %c0_2 = arith.constant 0 : index
    %1 = vector.load %arg3[%c0_1, %c0_2] : memref<80x1xf32, #tpu.memory_space<vmem>>, vector<80x1xf32>
    %c0_3 = arith.constant 0 : index
    %c0_4 = arith.constant 0 : index
    %2 = vector.load %arg4[%c0_3, %c0_4] : memref<10x80xbf16, #tpu.memory_space<vmem>>, vector<10x80xbf16>
    %c0_5 = arith.constant 0 : index
    %c0_6 = arith.constant 0 : index
    %3 = vector.load %arg5[%c0_5, %c0_6] : memref<10x1xf32, #tpu.memory_space<vmem>>, vector<10x1xf32>
    %c0_7 = arith.constant 0 : index
    %c0_8 = arith.constant 0 : index
    %4 = vector.load %arg6[%c0_7, %c0_8] : memref<10x1xf32, #tpu.memory_space<vmem>>, vector<10x1xf32>
    %c0_9 = arith.constant 0 : index
    %c0_10 = arith.constant 0 : index
    %5 = vector.load %arg7[%c0_9, %c0_10] : memref<1x1xf32, #tpu.memory_space<vmem>>, vector<1x1xf32>
    %c0_11 = arith.constant 0 : index
    %c0_12 = arith.constant 0 : index
    %6 = vector.load %arg1[%c0_11, %c0_12] : memref<128x32xf32, #tpu.memory_space<vmem>>, vector<128x32xf32>
    %7 = arith.truncf %6 : vector<128x32xf32> to vector<128x32xbf16>
    %cst = arith.constant dense<0.000000e+00> : vector<80x128xf32>
    %8 = tpu.matmul %0, %7, %cst {dimension_numbers = #tpu.dot_dimension_numbers<[1], [1], [0], [0], [0, 0, 1, 0], [], []>} : vector<80x32xbf16>, vector<128x32xbf16>, vector<80x128xf32> -> vector<80x128xf32>
    %9 = vector.broadcast %1 : vector<80x1xf32> to vector<80x128xf32>
    %10 = arith.addf %8, %9 : vector<80x128xf32>
    %cst_13 = arith.constant 0.000000e+00 : f32
    %11 = vector.broadcast %cst_13 : f32 to vector<80x128xf32>
    %12 = arith.maximumf %10, %11 : vector<80x128xf32>
    %13 = arith.truncf %12 : vector<80x128xf32> to vector<80x128xbf16>
    %cst_14 = arith.constant dense<0.000000e+00> : vector<10x128xf32>
    %14 = tpu.matmul %2, %13, %cst_14 {dimension_numbers = #tpu.dot_dimension_numbers<[1], [0], [0], [1], [0, 0, 1, 1], [], []>} : vector<10x80xbf16>, vector<80x128xbf16>, vector<10x128xf32> -> vector<10x128xf32>
    %15 = vector.broadcast %3 : vector<10x1xf32> to vector<10x128xf32>
    %16 = arith.addf %14, %15 : vector<10x128xf32>
    %cst_15 = arith.constant 0.000000e+00 : f32
    %17 = vector.broadcast %cst_15 : f32 to vector<10x128xf32>
    %18 = arith.maximumf %16, %17 : vector<10x128xf32>
    %19 = vector.broadcast %4 : vector<10x1xf32> to vector<10x128xf32>
    %20 = arith.mulf %18, %19 : vector<10x128xf32>
    %cst_16 = arith.constant dense<0.000000e+00> : vector<128xf32>
    %21 = vector.multi_reduction <add>, %20, %cst_16 [0] : vector<10x128xf32> to vector<128xf32>
    %22 = vector.shape_cast %21 : vector<128xf32> to vector<1x128xf32>
    %23 = vector.broadcast %5 : vector<1x1xf32> to vector<1x128xf32>
    %24 = arith.addf %22, %23 : vector<1x128xf32>
    %c0_17 = arith.constant 0 : index
    %c0_18 = arith.constant 0 : index
    %25 = vector.load %arg8[%c0_17, %c0_18] : memref<1x128xf32, #tpu.memory_space<vmem>>, vector<1x128xf32>
    tpu.vector_store %arg8[%c0_17, %c0_18], %24 {strides = array<i32>} : memref<1x128xf32, #tpu.memory_space<vmem>>, vector<1x128xf32>,
    return
  }
  func.func @transform_0(%arg0: i32) -> (i32, i32) {
    %c0_i32 = arith.constant 0 : i32
    %c0_i32_0 = arith.constant 0 : i32
    return %arg0, %c0_i32 : i32, i32
  }
  func.func @transform_1(%arg0: i32) -> (i32, i32) {
    %c0_i32 = arith.constant 0 : i32
    %c0_i32_0 = arith.constant 0 : i32
    %c0_i32_1 = arith.constant 0 : i32
    return %c0_i32, %c0_i32_0 : i32, i32
  }
  func.func @transform_2(%arg0: i32) -> (i32, i32) {
    %c0_i32 = arith.constant 0 : i32
    %c0_i32_0 = arith.constant 0 : i32
    %c0_i32_1 = arith.constant 0 : i32
    return %c0_i32, %c0_i32_0 : i32, i32
  }
  func.func @transform_3(%arg0: i32) -> (i32, i32) {
    %c0_i32 = arith.constant 0 : i32
    %c0_i32_0 = arith.constant 0 : i32
    %c0_i32_1 = arith.constant 0 : i32
    return %c0_i32, %c0_i32_0 : i32, i32
  }
  func.func @transform_4(%arg0: i32) -> (i32, i32) {
    %c0_i32 = arith.constant 0 : i32
    %c0_i32_0 = arith.constant 0 : i32
    %c0_i32_1 = arith.constant 0 : i32
    return %c0_i32, %c0_i32_0 : i32, i32
  }
  func.func @transform_5(%arg0: i32) -> (i32, i32) {
    %c0_i32 = arith.constant 0 : i32
    %c0_i32_0 = arith.constant 0 : i32
    %c0_i32_1 = arith.constant 0 : i32
    return %c0_i32, %c0_i32_0 : i32, i32
  }
  func.func @transform_6(%arg0: i32) -> (i32, i32) {
    %c0_i32 = arith.constant 0 : i32
    %c0_i32_0 = arith.constant 0 : i32
    %c0_i32_1 = arith.constant 0 : i32
    return %c0_i32, %c0_i32_0 : i32, i32
  }
  func.func @transform_7(%arg0: i32) -> (i32, i32) {
    %c0_i32 = arith.constant 0 : i32
    %c0_i32_0 = arith.constant 0 : i32
    return %c0_i32, %arg0 : i32, i32
  }
}

</mosaic_0001>

<bundles_post_ra>
// kernel: tpu_custom_call.1
= control target key start
LH: loop header
LB: loop body
LE: loop exit
PB: predicated region body
PF: predicated region fallthrough
CT: control target
= control target key end

     0   :  { %s580_s0 = inlined_call_operand.vmem [shape: f32[8,32], index: 0, kind: input, shape index: {}]   ;;  %s581_s1 = inlined_call_operand.vmem [shape: bf16[80,32], index: 1, kind: input, shape index: {}]   ;;  %s582_s2 = inlined_call_operand.vmem [shape: f32[80,1], index: 2, kind: input, shape index: {}]   ;;  %s583_s3 = inlined_call_operand.vmem [shape: bf16[10,80], index: 3, kind: input, shape index: {}]   ;;  %s584_s4 = inlined_call_operand.vmem [shape: f32[10,1], index: 4, kind: input, shape index: {}]   ;;  %s585_s5 = inlined_call_operand.vmem [shape: f32[10,1], index: 5, kind: input, shape index: {}]   ;;  %s586_s6 = inlined_call_operand.<no memory space> [shape: f32[1,1], index: 6, kind: input, shape index: {}]   ;;  %s587_s7 = inlined_call_operand.hbm [shape: f32[1,128], index: 7, kind: output, shape index: {}]  }
   0x1   :  { %v12_v0 = vstv %s586_s6 }
   0x2   :  { %13 = vst [vmem:[#allocation2] sm:$0x1] %v12_v0 }
   0x3   :  { %v71_v1 = vld [vmem:[%s580_s0 + $0x70] sm:$0xff]  ;;  %v72_v2 = vld [vmem:[%s580_s0 + $0x78] sm:$0xff]  ;;  %vm156_vm0 = vcmask 261120   ;;  %v69_v4 = vld [vmem:[%s580_s0 + $0x60] sm:$0xff] }
   0x4   :  { %v80_v3 = vpack.c.bf16 %v72_v2, %v71_v1  ;;  %v70_v5 = vld [vmem:[%s580_s0 + $0x68] sm:$0xff] }
   0x6   :  { %v194_v6 = vsel %vm156_vm0, %v80_v3, 0 }
   0x7   :  { %14 = vsyncpa [#allocation4], 0  ;;  %196 = vmatpush.bf16.xpose.msra.mxu0 %v194_v6  ;;  %362 = vmatpush.bf16.xpose.msra.mxu3 %v194_v6  ;;  %v79_v7 = vpack.c.bf16 %v70_v5, %v69_v4  ;;  %v67_v9 = vld [vmem:[%s580_s0 + $0x50] sm:$0xff]  ;;  %v68_v10 = vld [vmem:[%s580_s0 + $0x58] sm:$0xff]  ;;  %v408_v20 = vmov 0   ;;  %vm260_vm1 = vcmask 654336  }
   0x8   :  { %361 = vmatpush.bf16.xpose.msra.mxu2 %v194_v6  ;;  %v78_v11 = vpack.c.bf16 %v68_v10, %v67_v9  ;;  %v65_v13 = vld [vmem:[%s580_s0 + $0x40] sm:$0xff]  ;;  %v66_v14 = vld [vmem:[%s580_s0 + $0x48] sm:$0xff]  ;;  %v63_v17 = vld [vmem:[%s580_s0 + $0x30] sm:$0xff]  ;;  %379 = vset.pattern.permute.xlu0 %v408_v20  ;;  %vm292_vm2 = vcmask 1041408   ;;  %s316_s25 = sshll.u32 %s587_s7, 4  ;;  %s317_s25 = int_to_ptr.hbm [resolvable:$true] %s316_s25 }
   0x9   :  { %v191_v8 = vsel %vm156_vm0, %v79_v7, 0  ;;  %v77_v15 = vpack.c.bf16 %v66_v14, %v65_v13  ;;  %v64_v18 = vld [vmem:[%s580_s0 + $0x38] sm:$0xff]  ;;  %380 = vset.pattern.permute.xlu1 %v408_v20  ;;  %381 = vset.pattern.permute.xlu2 %v408_v20  ;;  %v61_v22 = vld [vmem:[%s580_s0 + $0x20] sm:$0xff]  ;;  %v62_v23 = vld [vmem:[%s580_s0 + $0x28] sm:$0xff] }
   0xa   :  { %v188_v12 = vsel %vm156_vm0, %v78_v11, 0  ;;  %v76_v19 = vpack.c.bf16 %v64_v18, %v63_v17  ;;  %v48_v24 = vld [vmem:[%s582_s2 + $0x40] sm:$0xff]  ;;  %v46_v25 = vld [vmem:[%s582_s2 + $0x30] sm:$0xff]  ;;  %v75_v26 = vpack.c.bf16 %v62_v23, %v61_v22  ;;  %v60_v29 = vld [vmem:[%s580_s0 + $0x18] sm:$0xff] }
   0xb   :  { %v185_v16 = vsel %vm156_vm0, %v77_v15, 0  ;;  %123 = vperm.xlu0 %379, %v48_v24   ;;  %113 = vperm.xlu1 %380, %v46_v25   ;;  %v59_v28 = vld [vmem:[%s580_s0 + $0x10] sm:$0xff]  ;;  %v49_v30 = vld [vmem:[%s582_s2 + $0x48] sm:$0xff]  ;;  %v47_v31 = vld [vmem:[%s582_s2 + $0x38] sm:$0xff] }
   0xc   :  { %v182_v21 = vsel %vm156_vm0, %v76_v19, 0  ;;  %v179_v27 = vsel %vm156_vm0, %v75_v26, 0  ;;  %v74_v32 = vpack.c.bf16 %v60_v29, %v59_v28  ;;  %v57_v34 = vld [vmem:[%s580_s0] sm:$0xff]  ;;  %v58_v35 = vld [vmem:[%s580_s0 + $0x8] sm:$0xff]  ;;  %v42_v36 = vld [vmem:[%s582_s2 + $0x10] sm:$0xff] }
   0xd   :  { %v43_v37 = vld [vmem:[%s582_s2 + $0x18] sm:$0xff]  ;;  %v44_v38 = vld [vmem:[%s582_s2 + $0x20] sm:$0xff]  ;;  %v73_v39 = vpack.c.bf16 %v58_v35, %v57_v34  ;;  %v41_v41 = vld [vmem:[%s582_s2 + $0x8] sm:$0xff] }
   0xe   :  { %v176_v33 = vsel %vm156_vm0, %v74_v32, 0  ;;  %103 = vperm.xlu2 %381, %v44_v38   ;;  %v53_v42 = vld [vmem:[%s584_s4 + $0x8] sm:$0x3]  ;;  %v355_v44 = vld [vmem:[%s581_s1] sm:$0xff]  ;;  %v358_v45 = vld [vmem:[%s581_s1 + $0x18] sm:$0xff] }
   0xf   :  { %197 = vmatpush.bf16.xpose.msra.mxu0 %v191_v8  ;;  %364 = vmatpush.bf16.xpose.msra.mxu3 %v191_v8  ;;  %v173_v40 = vsel %vm156_vm0, %v73_v39, 0  ;;  %v45_v43 = vld [vmem:[%s582_s2 + $0x28] sm:$0xff]  ;;  %v357_v46 = vld [vmem:[%s581_s1 + $0x10] sm:$0xff]  ;;  %v54_v48 = vld [vmem:[%s585_s5] sm:$0xff] }
  0x10   :  { %363 = vmatpush.bf16.xpose.msra.mxu2 %v191_v8  ;;  %v55_v47 = vld [vmem:[%s585_s5 + $0x8] sm:$0x3]  ;;  %v40_v49 = vld [vmem:[%s582_s2] sm:$0xff] }
  0x11   :  { %v52_v50 = vld [vmem:[%s584_s4] sm:$0xff]  ;;  %v356_v51 = vld [vmem:[%s581_s1 + $0x8] sm:$0xff] }
  0x12   :  { %v359_v52 = vld [vmem:[%s581_s1 + $0x20] sm:$0xff] }
  0x13   :  { %128 = vperm.xlu0 %379, %v49_v30   ;;  %118 = vperm.xlu1 %380, %v47_v31   ;;  %v56_v53 = vld [vmem:[#allocation2] sm:$0x1]  ;;  %v360_v35 = vld [vmem:[%s583_s3] sm:$0x10] }
  0x14   :  { %v352_v34 = vld [vmem:[%s583_s3] sm:$0xf]  ;;  %s409_s3 = smov [#allocation3]  }
  0x15   :  { %s314_s23 = sshll.u32 %s409_s3, 4  ;;  %s315_s23 = int_to_ptr.vmem [resolvable:$true] %s314_s23 }
  0x16   :  { %108 = vperm.xlu2 %381, %v45_v43  }
  0x17   :  { %198 = vmatpush.bf16.xpose.msra.mxu0 %v188_v12  ;;  %366 = vmatpush.bf16.xpose.msra.mxu3 %v188_v12 }
  0x18   :  { %365 = vmatpush.bf16.xpose.msra.mxu2 %v188_v12 }
  0x1b   :  { %93 = vperm.xlu0 %379, %v42_v36   ;;  %98 = vperm.xlu1 %380, %v43_v37   ;;  %v353_v37 = vor.u32 %v360_v35, %v352_v34 }
  0x1e   :  { %83 = vperm.xlu2 %381, %v40_v49  }
  0x1f   :  { %199 = vmatpush.bf16.xpose.msra.mxu0 %v185_v16  ;;  %368 = vmatpush.bf16.xpose.msra.mxu3 %v185_v16 }
  0x20   :  { %367 = vmatpush.bf16.xpose.msra.mxu2 %v185_v16 }
  0x23   :  { %88 = vperm.xlu0 %379, %v41_v41   ;;  %252 = vperm.xlu1 %380, %v53_v42  }
  0x26   :  { %247 = vperm.xlu2 %381, %v52_v50  }
  0x27   :  { %200 = vmatpush.bf16.xpose.msra.mxu0 %v182_v21  ;;  %370 = vmatpush.bf16.xpose.msra.mxu3 %v182_v21 }
  0x28   :  { %369 = vmatpush.bf16.xpose.msra.mxu2 %v182_v21 }
  0x2b   :  { %287 = vperm.xlu0 %379, %v55_v47   ;;  %282 = vperm.xlu1 %380, %v54_v48  }
  0x2e   :  { %303 = vperm.xlu2 %381, %v56_v53  }
  0x2f   :  { %201 = vmatpush.bf16.xpose.msra.mxu0 %v179_v27  ;;  %372 = vmatpush.bf16.xpose.msra.mxu3 %v179_v27 }
  0x30   :  { %371 = vmatpush.bf16.xpose.msra.mxu2 %v179_v27 }
  0x37   :  { %202 = vmatpush.bf16.xpose.msra.mxu0 %v176_v33  ;;  %374 = vmatpush.bf16.xpose.msra.mxu3 %v176_v33 }
  0x38   :  { %373 = vmatpush.bf16.xpose.msra.mxu2 %v176_v33 }
  0x3f   :  { %203 = vmatpush.bf16.xpose.msra.mxu0 %v173_v40  ;;  %376 = vmatpush.bf16.xpose.msra.mxu3 %v173_v40 }
  0x40   :  { %375 = vmatpush.bf16.xpose.msra.mxu2 %v173_v40 }
  0x46   :  { %345 = vmatmul.msk.bf16.vlgmr.msra.gmra.mxu0 %vm156_vm0, %v355_v44  ;;  %348 = vmatmul.msk.bf16.vlgmr.msra.gmra.mxu3 %vm156_vm0, %v358_v45 }
  0x47   :  { %347 = vmatmul.msk.bf16.vlgmr.msra.gmra.mxu2 %vm156_vm0, %v357_v46 }
  0x56   :  { %346 = vmatmul.msk.bf16.gmra.mxu0 %vm156_vm0, %v356_v51  ;;  %349 = vmatmul.msk.bf16.gmra.mxu3 %vm156_vm0, %v359_v52 }
  0x68   :  { %v104_v61 = vpop.permute.xlu2 %103 }
  0x70   :  { %v109_v4 = vpop.permute.xlu2 %108 }
  0x78   :  { %v84_v25 = vpop.permute.xlu2 %83 }
  0x7d   :  { %v124_v56 = vpop.permute.xlu0 %123  ;;  %v114_v59 = vpop.permute.xlu1 %113 }
  0x80   :  { %v248_v40 = vpop.permute.xlu2 %247 }
  0x85   :  { %v129_v60 = vpop.permute.xlu0 %128  ;;  %v119_v1 = vpop.permute.xlu1 %118 }
  0x8d   :  { %v94_v7 = vpop.permute.xlu0 %93  ;;  %v99_v18 = vpop.permute.xlu1 %98 }
  0x95   :  { %v89_v24 = vpop.permute.xlu0 %88  ;;  %v253_v39 = vpop.permute.xlu1 %252 }
  0x9d   :  { %v288_v46 = vpop.permute.xlu0 %287  ;;  %v283_v47 = vpop.permute.xlu1 %282 }
  0xc3   :  { %v205_v54 = vpop.f32.mrf.mxu0 }
  0xc4   :  { %v206_v27 = vadd.f32 %v205_v54, %v84_v25 }
  0xc6   :  { %v230_v32 = vmax.f32 %v206_v27, 0.0 }
  0xc9   :  { %v220_v55 = vpop.f32.mrf.mxu3 }
  0xca   :  { %v215_v62 = vpop.f32.mrf.mxu2  ;;  %v221_v9 = vadd.f32 %v220_v55, %v114_v59 }
  0xcb   :  { %v207_v58 = vpop.f32.mrf.mxu0  ;;  %v216_v13 = vadd.f32 %v215_v62, %v104_v61 }
  0xcc   :  { %v236_v17 = vmax.f32 %v221_v9, 0.0  ;;  %v208_v26 = vadd.f32 %v207_v58, %v89_v24 }
  0xcd   :  { %v234_v19 = vmax.f32 %v216_v13, 0.0 }
  0xce   :  { %v231_v31 = vmax.f32 %v208_v26, 0.0 }
  0xd0   :  { %v240_v36 = vpack.c.bf16 %v231_v31, %v230_v32 }
  0xd1   :  { %v222_v57 = vpop.f32.mrf.mxu3 }
  0xd2   :  { %v223_v5 = vadd.f32 %v222_v57, %v119_v1  ;;  %v217_v8 = vpop.f32.mrf.mxu2 }
  0xd3   :  { %v210_v0 = vpop.f32.mrf.mxu0  ;;  %v218_v14 = vadd.f32 %v217_v8, %v109_v4 }
  0xd4   :  { %v237_v12 = vmax.f32 %v223_v5, 0.0  ;;  %v211_v23 = vadd.f32 %v210_v0, %v94_v7 }
  0xd5   :  { %v235_v21 = vmax.f32 %v218_v14, 0.0 }
  0xd6   :  { %v243_v22 = vpack.c.bf16 %v237_v12, %v236_v17  ;;  %v232_v30 = vmax.f32 %v211_v23, 0.0 }
  0xd7   :  { %v242_v29 = vpack.c.bf16 %v235_v21, %v234_v19 }
  0xd9   :  { %v225_v63 = vpop.f32.mrf.mxu3 }
  0xda   :  { %v226_v2 = vadd.f32 %v225_v63, %v124_v56  ;;  %v304_v56 = vpop.permute.xlu2 %303 }
  0xdb   :  { %v212_v16 = vpop.f32.mrf.mxu0  ;;  %v306_v58 = vperm.slane %v304_v56, 0 }
  0xdc   :  { %v238_v10 = vmax.f32 %v226_v2, 0.0  ;;  %v213_v20 = vadd.f32 %v212_v16, %v99_v18 }
  0xde   :  { %v233_v28 = vmax.f32 %v213_v20, 0.0 }
  0xe0   :  { %v241_v33 = vpack.c.bf16 %v233_v28, %v232_v30 }
  0xe1   :  { %v227_v3 = vpop.f32.mrf.mxu3 }
  0xe2   :  { %v228_v6 = vadd.f32 %v227_v3, %v129_v60 }
  0xe4   :  { %v239_v11 = vmax.f32 %v228_v6, 0.0 }
  0xe6   :  { %v244_v15 = vpack.c.bf16 %v239_v11, %v238_v10 }
  0xe8   :  { %267 = vmatpush.bf16.msra.mxu1 %v244_v15 }
  0xec   :  { %268 = vmatpush.bf16.msra.mxu1 %v243_v22 }
  0xf0   :  { %269 = vmatpush.bf16.msra.mxu1 %v242_v29 }
  0xf4   :  { %270 = vmatpush.bf16.msra.mxu1 %v241_v33 }
  0xf8   :  { %271 = vmatpush.bf16.msra.mxu1 %v240_v36 }
  0xfb   :  { %354 = vmatmul.msk.bf16.vlgmr.msra.gmra.mxu1 %vm260_vm1, %v353_v37 }
 0x178   :  { %v273_v38 = vpop.f32.mrf.mxu1 }
 0x179   :  { %v274_v41 = vadd.f32 %v273_v38, %v248_v40 }
 0x17b   :  { %v278_v44 = vmax.f32 %v274_v41, 0.0 }
 0x17d   :  { %v290_v49 = vmul.f32 %v283_v47, %v278_v44 }
 0x180   :  { %v275_v42 = vpop.f32.mrf.mxu1 }
 0x181   :  { %v276_v43 = vadd.f32 %v275_v42, %v253_v39 }
 0x183   :  { %v279_v45 = vmax.f32 %v276_v43, 0.0 }
 0x185   :  { %v291_v48 = vmul.f32 %v288_v46, %v279_v45 }
 0x187   :  { %v293_v50 = vsel %vm292_vm2, %v291_v48, 0.0 }
 0x188   :  { %v294_v51 = vadd.f32 %v293_v50, %v290_v49 }
 0x18a   :  { %v295_v52 = vrot.slane %v294_v51, 4 }
 0x18c   :  { %v296_v53 = vadd.f32 %v295_v52, %v294_v51 }
 0x18e   :  { %v297_v54 = vrot.slane %v296_v53, 2 }
 0x190   :  { %v298_v55 = vadd.f32 %v297_v54, %v296_v53 }
 0x192   :  { %v299_v57 = vrot.slane %v298_v55, 1 }
 0x194   :  { %v300_v59 = vadd.f32 %v299_v57, %v298_v55 }
 0x196   :  { %v307_v60 = vadd.f32 %v306_v58, %v300_v59 }
 0x198   :  { %308 = vst [vmem:[#allocation3] sm:$0x1] %v307_v60 }
 0x199   :  { %319 = dma.vmem_to_hbm [thread:$0]  %s315_s23, 16, %s317_s25, [#allocation4]  }
 0x19a   :  { %406 = dma.done.wait [#allocation4], 16  }
 0x19b   :  { %407 = vsyncadd [#allocation4], 4294967280 }
 0x19c   :  { %324 = vsyncpa [#allocation4], 1 }

</bundles_post_ra>
